<compile_context>
chip_gen: v5e
topology: v5e:2x2
jax: 0.10.0
libtpu: 0.0.40
codegen_flags: <defaults>
</compile_context>

<pallas_src>
import math

import jax
import jax.numpy as jnp
from jax import lax
from jax.experimental import pallas as pl
from jax.experimental.pallas import tpu as pltpu


# ---------------------------------------------------------------------------
# Helpers
# ---------------------------------------------------------------------------
def _choose_tile(total, preferred, sublane=8):
    """Largest divisor of `total` <= `preferred`, preferring 256/128-aligned
    (MXU / lane friendly) tiles, then sublane-aligned divisors; falls back to
    the full dimension (always a legal block)."""
    if total <= preferred:
        return total
    for align in (256, 128, sublane):
        t = (preferred // align) * align
        while t > 0:
            if total % t == 0:
                return t
            t -= align
    return total


def _vmem_limit_bytes():
    """Generation-aware scoped-VMEM budget (v5e/v6e: 128 MiB, v7x: 64 MiB)."""
    try:
        cap = int(pltpu.get_tpu_info().vmem_capacity_bytes)
    except Exception:
        cap = 64 * 1024 * 1024
    return max(32 * 1024 * 1024, min(100 * 1024 * 1024, (cap * 3) // 4))


# ---------------------------------------------------------------------------
# Kernel 1: fused QKV projection over the flattened (B*T, C) activations.
# One lane-dense (tm, tn) output block; q/k/v are split outside the kernel.
# ---------------------------------------------------------------------------
def _qkv_proj_kernel(x_ref, w_ref, qkv_ref):
    qkv_ref[...] = jnp.dot(
        x_ref[...], w_ref[...],
        preferred_element_type=jnp.float32).astype(qkv_ref.dtype)


# ---------------------------------------------------------------------------
# Kernel 2: flash-style causal attention with online softmax.
# ---------------------------------------------------------------------------
def _flash_attn_kernel(q_ref, k_ref, v_ref, o_ref, m_sc, l_sc, acc_sc):
    # q_ref: (1, tq, d_k)  k_ref: (1, tk, d_k)  v_ref: (1, tk, d_v)
    # o_ref: (1, tq, d_v)  scratch: m/l (tq, 1) f32, acc (tq, d_v) f32
    qi = pl.program_id(1)
    ki = pl.program_id(2)
    tq = q_ref.shape[1]
    tk = k_ref.shape[1]
    sqrt_dk = math.sqrt(k_ref.shape[-1])

    @pl.when(ki == 0)
    def _():
        m_sc[...] = jnp.full_like(m_sc, -jnp.inf)
        l_sc[...] = jnp.zeros_like(l_sc)
        acc_sc[...] = jnp.zeros_like(acc_sc)

    def _scores():
        # Contract on the last dims of both operands -> no (tk, d_k) transpose.
        return lax.dot_general(q_ref[0], k_ref[0], (((1,), (1,)), ((), ())),
                               preferred_element_type=jnp.float32)  # (tq, tk)

    def _update(s):
        # Online softmax update (f32 throughout; P dropped to V's dtype for MXU).
        v = v_ref[0]
        m_prev = m_sc[...]
        m_new = jnp.maximum(m_prev, jnp.max(s, axis=-1, keepdims=True))
        alpha = jnp.exp(m_prev - m_new)
        p = jnp.exp(s - m_new)
        l_sc[...] = alpha * l_sc[...] + jnp.sum(p, axis=-1, keepdims=True)
        acc_sc[...] = alpha * acc_sc[...] + jnp.dot(
            p.astype(v.dtype), v, preferred_element_type=jnp.float32)
        m_sc[...] = m_new

    # Tile classification (ki = 0 is always processed, so every Q row sees at
    # least one unmasked column before any fully-masked tile -> no exp NaNs).
    below_diag = ki * tk < (qi + 1) * tq       # tile has any unmasked entry
    on_diag = (ki + 1) * tk > qi * tq          # tile intersects the diagonal

    @pl.when(below_diag & on_diag)
    def _():
        s = _scores()
        # col_global <= row_global  <=>  (col_l - row_l) <= qi*tq - ki*tk
        diff = (lax.broadcasted_iota(jnp.int32, (tq, tk), 1)
                - lax.broadcasted_iota(jnp.int32, (tq, tk), 0))
        s = jnp.where(diff <= qi * tq - ki * tk, s, -jnp.inf)
        _update(s)

    @pl.when(below_diag & jnp.logical_not(on_diag))   # strictly below diagonal
    def _():
        _update(_scores())                            # no mask needed

    @pl.when(ki == pl.num_programs(2) - 1)
    def _():
        # Fold the module's post-PV 1/sqrt(d_k) into the softmax normalization:
        # (p/l) @ v / sqrt(d_k) == acc * 1/(l * sqrt(d_k)).
        inv = pl.reciprocal(l_sc[...] * sqrt_dk, approx=True)
        # NOTE: with d_v < 128 this store is lane-masked; at realistic head
        # dims (128+) it becomes lane-dense automatically.
        o_ref[0] = (acc_sc[...] * inv).astype(o_ref.dtype)


# ---------------------------------------------------------------------------
# Wrapper
# ---------------------------------------------------------------------------
def attention_block(x, wq_t, wk_t, wv_t, *, compute_dtype=jnp.bfloat16,
                    tq_pref=512, tk_pref=256, tm_pref=512, tn_pref=512):
    """x: (B, T, C); wq_t/wk_t: (C, d_k); wv_t: (C, d_v). Returns (B, T, d_v)
    in x.dtype.  Internals run in `compute_dtype` (None -> x.dtype)."""
    B, T, C = x.shape
    d_k = wq_t.shape[1]
    d_v = wv_t.shape[1]
    d_qkv = 2 * d_k + d_v
    out_dtype = x.dtype

    cdt = jnp.dtype(compute_dtype) if compute_dtype is not None else jnp.dtype(x.dtype)
    sublane = max(8, (32 // (cdt.itemsize * 8)) * 8)   # 8 f32, 16 bf16, 32 i8
    vmem_limit = _vmem_limit_bytes()

    xc = x.astype(cdt)
    w_qkv = jnp.concatenate([wq_t, wk_t, wv_t], axis=1).astype(cdt)  # (C, d_qkv)

    # ---- fused QKV projection: one MXU pass, one lane-dense output ----------
    M = B * T
    x_flat = xc.reshape(M, C)
    tm = _choose_tile(M, tm_pref, sublane)
    tn = _choose_tile(d_qkv, tn_pref, sublane)

    qkv_flat = pl.pallas_call(
        _qkv_proj_kernel,
        out_shape=jax.ShapeDtypeStruct((M, d_qkv), cdt),
        grid_spec=pltpu.PrefetchScalarGridSpec(
            num_scalar_prefetch=0,
            grid=(M // tm, d_qkv // tn),
            in_specs=[pl.BlockSpec((tm, C), lambda i, j: (i, 0)),
                      pl.BlockSpec((C, tn), lambda i, j: (0, j))],
            out_specs=pl.BlockSpec((tm, tn), lambda i, j: (i, j))),
        compiler_params=pltpu.CompilerParams(
            dimension_semantics=("parallel", "parallel"),
            vmem_limit_bytes=vmem_limit),
    )(x_flat, w_qkv)

    # Split q/k/v outside the kernel (cheap XLA slices; avoids in-kernel
    # lane-crossing slices and three lane-masked kernel outputs).
    qkv = qkv_flat.reshape(B, T, d_qkv)
    q = qkv[..., :d_k]
    k = qkv[..., d_k:2 * d_k]
    v = qkv[..., 2 * d_k:]

    # ---- flash-style causal attention ---------------------------------------
    tq = _choose_tile(T, tq_pref, sublane)
    tk = _choose_tile(T, tk_pref, sublane)
    nk = T // tk

    # Clamp K/V block indices for fully-masked (above-diagonal) steps so the
    # pipeline keeps the already-resident block instead of re-fetching.
    def _kv_index(b, qi, ki):
        return (b, jnp.minimum(ki, ((qi + 1) * tq - 1) // tk), 0)

    return pl.pallas_call(
        _flash_attn_kernel,
        out_shape=jax.ShapeDtypeStruct((B, T, d_v), out_dtype),
        grid_spec=pltpu.PrefetchScalarGridSpec(
            num_scalar_prefetch=0,
            grid=(B, T // tq, nk),
            in_specs=[pl.BlockSpec((1, tq, d_k), lambda b, qi, ki: (b, qi, 0)),
                      pl.BlockSpec((1, tk, d_k), _kv_index),
                      pl.BlockSpec((1, tk, d_v), _kv_index)],
            out_specs=pl.BlockSpec((1, tq, d_v), lambda b, qi, ki: (b, qi, 0)),
            scratch_shapes=[pltpu.VMEM((tq, 1), jnp.float32),
                            pltpu.VMEM((tq, 1), jnp.float32),
                            pltpu.VMEM((tq, d_v), jnp.float32)]),
        compiler_params=pltpu.CompilerParams(
            dimension_semantics=("parallel", "parallel", "arbitrary"),
            vmem_limit_bytes=vmem_limit),
    )(q, k, v)


# ---------------------------------------------------------------------------
# Pure-JAX reference (mirrors the PyTorch module, eval mode)
# ---------------------------------------------------------------------------
def _reference(x, wq_t, wk_t, wv_t):
    q = x @ wq_t
    k = x @ wk_t
    v = x @ wv_t
    s = jnp.einsum("btk,bsk->bts", q, k)
    T = x.shape[1]
    mask = jnp.tril(jnp.ones((T, T), dtype=bool))
    s = jnp.where(mask, s, -jnp.inf)
    p = jax.nn.softmax(s, axis=-1)
    return jnp.einsum("bts,bsv->btv", p, v) / math.sqrt(k.shape[-1])


if __name__ == "__main__":
    # Module config (synthetic, deterministic init):
    d_in, d_k, d_v, block_size, dropout_rate = 32, 16, 16, 8, 0.1
    B, T = 2, block_size

    key = jax.random.PRNGKey(0)
    kx, kq, kk, kv = jax.random.split(key, 4)

    x = jax.random.normal(kx, (B, T, d_in), dtype=jnp.float32)
    # nn.Linear weights are (out, in); store their transposes (in, out).
    bound = 1.0 / math.sqrt(d_in)
    wq_t = jax.random.uniform(kq, (d_in, d_k), jnp.float32, -bound, bound)
    wk_t = jax.random.uniform(kk, (d_in, d_k), jnp.float32, -bound, bound)
    wv_t = jax.random.uniform(kv, (d_in, d_v), jnp.float32, -bound, bound)

    ref = _reference(x, wq_t, wk_t, wv_t)

    # Default (bf16 internals) — loose tolerance vs. the f32 reference.
    out = attention_block(x, wq_t, wk_t, wv_t)
    out = jax.block_until_ready(out)
    assert out.shape == (B, T, d_v)
    assert out.dtype == x.dtype
    assert jnp.allclose(out, ref, atol=3e-2, rtol=3e-2), "bf16 path mismatch"

    # f32 internals — tight tolerance (approx reciprocal ~2^-12 rel error).
    out_f32 = attention_block(x, wq_t, wk_t, wv_t, compute_dtype=None)
    out_f32 = jax.block_until_ready(out_f32)
    assert jnp.allclose(out_f32, ref, atol=1e-3, rtol=1e-3), "f32 path mismatch"

    print("KERNEL_OK")
</pallas_src>

<mosaic_0001>
module attributes {stable_mosaic.version = 11 : i64} {
  func.func @_qkv_proj_kernel(%arg0: i32, %arg1: i32, %arg2: memref<16x32xbf16, #tpu.memory_space<vmem>>, %arg3: memref<32x48xbf16, #tpu.memory_space<vmem>>, %arg4: memref<16x48xbf16, #tpu.memory_space<vmem>>) attributes {dimension_semantics = [#tpu.dimension_semantics<parallel>, #tpu.dimension_semantics<parallel>], iteration_bounds = array<i64: 1, 1>, scalar_prefetch = 0 : i64, scratch_operands = 0 : i64, tpu.core_type = #tpu.core_type<tc>, window_params = [{transform_indices = @transform_0, window_bounds = array<i64: 16, 32>}, {transform_indices = @transform_1, window_bounds = array<i64: 32, 48>}, {transform_indices = @transform_2, window_bounds = array<i64: 16, 48>}]} {
    %c0 = arith.constant 0 : index
    %c0_0 = arith.constant 0 : index
    %0 = vector.load %arg2[%c0, %c0_0] : memref<16x32xbf16, #tpu.memory_space<vmem>>, vector<16x32xbf16>
    %c0_1 = arith.constant 0 : index
    %c0_2 = arith.constant 0 : index
    %1 = vector.load %arg3[%c0_1, %c0_2] : memref<32x48xbf16, #tpu.memory_space<vmem>>, vector<32x48xbf16>
    %cst = arith.constant dense<0.000000e+00> : vector<16x48xf32>
    %2 = tpu.matmul %0, %1, %cst {dimension_numbers = #tpu.dot_dimension_numbers<[1], [0], [0], [1], [0, 0, 1, 1], [], []>} : vector<16x32xbf16>, vector<32x48xbf16>, vector<16x48xf32> -> vector<16x48xf32>
    %3 = arith.truncf %2 : vector<16x48xf32> to vector<16x48xbf16>
    %c0_3 = arith.constant 0 : index
    %c0_4 = arith.constant 0 : index
    %4 = vector.load %arg4[%c0_3, %c0_4] : memref<16x48xbf16, #tpu.memory_space<vmem>>, vector<16x48xbf16>
    tpu.vector_store %arg4[%c0_3, %c0_4], %3 {strides = array<i32>} : memref<16x48xbf16, #tpu.memory_space<vmem>>, vector<16x48xbf16>,
    return
  }
  func.func @transform_0(%arg0: i32, %arg1: i32) -> (i32, i32) {
    %c0_i32 = arith.constant 0 : i32
    %c0_i32_0 = arith.constant 0 : i32
    return %arg0, %c0_i32 : i32, i32
  }
  func.func @transform_1(%arg0: i32, %arg1: i32) -> (i32, i32) {
    %c0_i32 = arith.constant 0 : i32
    %c0_i32_0 = arith.constant 0 : i32
    return %c0_i32, %arg1 : i32, i32
  }
  func.func @transform_2(%arg0: i32, %arg1: i32) -> (i32, i32) {
    %c0_i32 = arith.constant 0 : i32
    return %arg0, %arg1 : i32, i32
  }
}

</mosaic_0001>

<bundles_post_ra>
// kernel: tpu_custom_call.1
= control target key start
LH: loop header
LB: loop body
LE: loop exit
PB: predicated region body
PF: predicated region fallthrough
CT: control target
= control target key end

     0   :  { %7 = vsyncpa [#allocation3], 0  ;;  %s248_s0 = inlined_call_operand.hbm [shape: bf16[16,32], index: 0, kind: input, shape index: {}]   ;;  %s249_s1 = inlined_call_operand.hbm [shape: bf16[32,48], index: 1, kind: input, shape index: {}]   ;;  %s250_s2 = inlined_call_operand.hbm [shape: bf16[16,48], index: 2, kind: output, shape index: {}]  }
   0x1   :  { %8 = vsyncpa [#allocation6], 0 }
   0x2   :  { %9 = vsyncpa [#allocation4], 0  ;;  %s14_s11 = sshll.u32 %s248_s0, 4  ;;  %s210_s12 = smov [#allocation2]   ;;  %s15_s11 = int_to_ptr.hbm [resolvable:$true] %s14_s11 }
   0x3   :  { %s16_s13 = sshll.u32 %s210_s12, 4  ;;  %s27_s16 = sshll.u32 %s249_s1, 4  ;;  %s17_s13 = int_to_ptr.vmem [resolvable:$true] %s16_s13  ;;  %s28_s16 = int_to_ptr.hbm [resolvable:$true] %s27_s16 }
   0x4   :  { %s211_s17 = smov 64   ;;  %s212_s18 = smov 4  }
   0x5   :  { %22 = dma.hbm_to_vmem [thread:$0]  %s15_s11, 128, %s17_s13, [#allocation3], %s211_s17, %s211_s17, %s212_s18  }
   0x6   :  { %s213_s19 = smov [#allocation5]  }
   0x7   :  { %s29_s20 = sshll.u32 %s213_s19, 4  ;;  %s30_s20 = int_to_ptr.vmem [resolvable:$true] %s29_s20 }
   0x8   :  { %35 = dma.hbm_to_vmem [thread:$0]  %s28_s16, 256, %s30_s20, [#allocation6], %s211_s17, %s211_s17, %s212_s18  }
   0x9   :  { %204 = dma.done.wait [#allocation3], 128  }
   0xa   :  { %205 = vsyncadd [#allocation3], 4294967168 }
   0xb   :  { %206 = dma.done.wait [#allocation6], 256  }
   0xc   :  { %207 = vsyncadd [#allocation6], 4294967040  ;;  %v126_v0 = vld [vmem:[#allocation5 + $0x8] sm:$0xff]  ;;  %v125_v1 = vld [vmem:[#allocation5] sm:$0xff]  ;;  %vm68_vm0 = vcmask 261120   ;;  %vm88_vm1 = vcmask 388096  }
   0xd   :  { %78 = vmatpush.bf16.msra.mxu0 %v126_v0  ;;  %v124_v2 = vld [vmem:[#allocation2] sm:$0xff]  ;;  %s214_s0 = smov [#allocation7]   ;;  %s97_s23 = sshll.u32 %s250_s2, 4  ;;  %s98_s23 = int_to_ptr.hbm [resolvable:$true] %s97_s23 }
   0xe   :  { %s95_s1 = sshll.u32 %s214_s0, 4  ;;  %s96_s1 = int_to_ptr.vmem [resolvable:$true] %s95_s1 }
  0x11   :  { %79 = vmatpush.bf16.msra.mxu0 %v125_v1 }
  0x14   :  { %123 = vmatmul.msk.bf16.vlgmr.msra.gmra.mxu0 %vm68_vm0, %v124_v2 }
  0x91   :  { %v81_v3 = vpop.f32.mrf.mxu0 }
  0x92   :  { %v86_v4 = vpack.c.bf16 %v81_v3, %v81_v3 }
  0x94   :  { %89 = vst.msk [vmem:[#allocation7] sm:$0xf] %vm88_vm1, %v86_v4 }
  0x99   :  { %v83_v5 = vpop.f32.mrf.mxu0 }
  0x9a   :  { %v87_v6 = vpack.c.bf16 %v83_v5, %v83_v5 }
  0x9c   :  { %90 = vst.msk [vmem:[#allocation7 + $0x4] sm:$0xf] %vm88_vm1, %v87_v6 }
  0x9d   :  { %103 = dma.vmem_to_hbm [thread:$0]  %s96_s1, 128, %s98_s23, [#allocation4], %s211_s17, %s211_s17, %s212_s18  }
  0x9e   :  { %208 = dma.done.wait [#allocation4], 128  }
  0x9f   :  { %209 = vsyncadd [#allocation4], 4294967168 }
  0xa0   :  { %108 = vsyncpa [#allocation3], 1 }
  0xa1   :  { %109 = vsyncpa [#allocation6], 1 }
  0xa2   :  { %110 = vsyncpa [#allocation4], 1 }

</bundles_post_ra>
